<compile_context>
chip_gen: v7x
topology: tpu7x:2x2x1
jax: 0.10.0
libtpu: 0.0.40
codegen_flags: <defaults>
</compile_context>

<pallas_src>
import jax
import jax.numpy as jnp
from jax.experimental import pallas as pl
from jax.experimental.pallas import tpu as pltpu


def _round_up(n, m):
    return ((n + m - 1) // m) * m


def _cdiv(a, b):
    return (a + b - 1) // b


def _sublane_multiple(dtype):
    # f32 -> 8 sublanes, bf16 -> 16, int8/fp8 -> 32 (packed-sublane friendly).
    return max(8, 32 // jnp.dtype(dtype).itemsize)


def _fold_factor(B, D, C, itemsize):
    """Number of batch rows folded into the lane dim (1 disables folding)."""
    if D >= 128 and C >= 128:
        return 1  # already lane-dense
    f, cand = 1, 1
    while True:
        cand += 1
        if cand * C > 128:                                   # keep out row in one vreg
            break
        if cand * D > 512:                                   # keep contraction depth sane
            break
        if (cand * D) * (cand * C) * itemsize > (4 << 20):   # block-diag weight cap
            break
        f = cand
    return max(1, min(f, B))  # don't pad a tiny batch up to a huge fold multiple


def _pick_dimension_semantics(num_steps):
    # On 2-TC-per-device chips (v7x/v5p/v4), CORE_PARALLEL actually splits the
    # bandwidth-bound batch axis across TensorCores; plain "parallel" does not.
    core_parallel = getattr(pltpu, "CORE_PARALLEL", None)
    kind = ""
    try:
        kind = jax.devices()[0].device_kind.lower()
    except Exception:
        pass
    multi_tc = any(tag in kind for tag in ("v7", "7x", "v4", "v5p"))
    if core_parallel is not None and multi_tc and num_steps >= 2:
        return (core_parallel,)
    return ("parallel",)


def _linear_kernel(x_ref, w_ref, b_ref, o_ref):
    # x_ref: [TB, K]   w_ref: [K, N] (block-diag folded W^T, VMEM-resident)
    # b_ref: [1, N]    o_ref: [TB, N]
    acc = jnp.dot(x_ref[...], w_ref[...], preferred_element_type=jnp.float32)
    o_ref[...] = (acc + b_ref[...].astype(jnp.float32)).astype(o_ref.dtype)


def logistic_regression_multiclass(x, weight, bias, *,
                                   target_block_bytes=4 << 20,
                                   vmem_budget_bytes=24 << 20):
    """x: [B, D], weight: [C, D] (PyTorch nn.Linear layout), bias: [C] -> logits [B, C]."""
    B, D = x.shape
    C = weight.shape[0]
    itemsize = jnp.dtype(x.dtype).itemsize
    sub = _sublane_multiple(x.dtype)

    # 1) Batch-fold factor: lane-densify input (K = f*D) and output (N = f*C).
    f = _fold_factor(B, D, C, itemsize)
    K, N = f * D, f * C
    K_lanes, N_lanes = _round_up(K, 128), _round_up(N, 128)   # VMEM lane padding

    # 2) Byte-budget-driven folded-batch tile, capped so 2x-buffered x/out blocks
    #    plus the resident weight/bias fit under the v7x scoped-VMEM default.
    w_bytes = K_lanes * N_lanes * itemsize + N_lanes * itemsize
    per_row = 2 * (K_lanes + N_lanes) * itemsize               # double-buffered x + out
    avail = vmem_budget_bytes - w_bytes
    cap_rows = max(sub, (avail // per_row) // sub * sub) if avail > 0 else sub
    tgt_rows = max(sub, (target_block_bytes // (K_lanes * itemsize)) // sub * sub)
    tb = min(cap_rows, tgt_rows)

    # 3) Modest padding: pick the grid count first, then the smallest sublane-aligned
    #    tile that covers it (avoids padding B up to a full huge-tile multiple).
    Bf = _cdiv(B, f)
    g = max(1, _cdiv(Bf, tb))
    tb = _round_up(_cdiv(Bf, g), sub)
    Bf_pad = g * tb
    B_pad = Bf_pad * f

    if B_pad != B:
        x = jnp.pad(x, ((0, B_pad - B), (0, 0)))
    x_f = x.reshape(Bf_pad, K)                                 # free contiguous view

    # Block-diagonal folded weight: W_bd[j*D:(j+1)*D, j*C:(j+1)*C] = W^T (built once).
    wt = weight.T                                              # [D, C]
    w_bd = jnp.einsum("jk,dc->jdkc", jnp.eye(f, dtype=wt.dtype), wt).reshape(K, N)
    b_bd = jnp.tile(bias, f).reshape(1, N)

    cost = pl.CostEstimate(
        flops=2 * Bf_pad * K * N,                              # folded MXU work
        transcendentals=0,
        bytes_accessed=itemsize * (Bf_pad * K + K * N + N + Bf_pad * N),
    )

    def build(dim_sem):
        return pl.pallas_call(
            _linear_kernel,
            out_shape=jax.ShapeDtypeStruct((Bf_pad, N), x.dtype),
            grid=(g,),
            in_specs=[
                pl.BlockSpec((tb, K), lambda i: (i, 0)),       # x: stream folded tiles
                pl.BlockSpec((K, N), lambda i: (0, 0)),        # weight: VMEM-resident
                pl.BlockSpec((1, N), lambda i: (0, 0)),        # bias: VMEM-resident
            ],
            out_specs=pl.BlockSpec((tb, N), lambda i: (i, 0)),
            compiler_params=pltpu.CompilerParams(
                dimension_semantics=dim_sem,
                vmem_limit_bytes=32 * 1024 * 1024,             # v7x-safe; blocks sized to fit
            ),
            cost_estimate=cost,
        )

    dim_sem = _pick_dimension_semantics(g)
    try:
        out_f = build(dim_sem)(x_f, w_bd, b_bd)
    except Exception:
        if dim_sem == ("parallel",):
            raise
        out_f = build(("parallel",))(x_f, w_bd, b_bd)          # single-TC / older-compiler fallback

    out = out_f.reshape(B_pad, C)                              # free contiguous un-fold
    return out[:B] if B_pad != B else out


if __name__ == "__main__":
    # Small shapes consistent with the module: input_dim=32, num_classes=10.
    batch, input_dim, num_classes = 8, 32, 10

    key = jax.random.PRNGKey(0)
    kx, kw, kb = jax.random.split(key, 3)

    # Deterministic parameter init (same shapes as nn.Linear(input_dim, num_classes)).
    bound = 1.0 / (input_dim ** 0.5)
    weight = jax.random.uniform(kw, (num_classes, input_dim),
                                minval=-bound, maxval=bound, dtype=jnp.float32)
    bias = jax.random.uniform(kb, (num_classes,),
                              minval=-bound, maxval=bound, dtype=jnp.float32)
    x = jax.random.normal(kx, (batch, input_dim), dtype=jnp.float32)

    out = logistic_regression_multiclass(x, weight, bias)
    jax.block_until_ready(out)

    # Cross-check against plain JAX reference.
    ref = x @ weight.T + bias
    assert out.shape == (batch, num_classes)
    assert jnp.allclose(out, ref, atol=1e-5, rtol=1e-5)

    print("KERNEL_OK")
</pallas_src>

<mosaic_0001>
module attributes {stable_mosaic.version = 11 : i64} {
  func.func @_linear_kernel(%arg0: i32, %arg1: memref<8x256xf32, #tpu.memory_space<vmem>>, %arg2: memref<256x80xf32, #tpu.memory_space<vmem>>, %arg3: memref<1x80xf32, #tpu.memory_space<vmem>>, %arg4: memref<8x80xf32, #tpu.memory_space<vmem>>) attributes {dimension_semantics = [#tpu.dimension_semantics<parallel>], iteration_bounds = array<i64: 1>, scalar_prefetch = 0 : i64, scratch_operands = 0 : i64, tpu.core_type = #tpu.core_type<tc>, window_params = [{transform_indices = @transform_0, window_bounds = array<i64: 8, 256>}, {pipeline_mode = #tpu.pipeline_mode<synchronous>, transform_indices = @transform_1, window_bounds = array<i64: 256, 80>}, {pipeline_mode = #tpu.pipeline_mode<synchronous>, transform_indices = @transform_2, window_bounds = array<i64: 1, 80>}, {transform_indices = @transform_3, window_bounds = array<i64: 8, 80>}]} {
    %c0 = arith.constant 0 : index
    %c0_0 = arith.constant 0 : index
    %0 = vector.load %arg1[%c0, %c0_0] : memref<8x256xf32, #tpu.memory_space<vmem>>, vector<8x256xf32>
    %c0_1 = arith.constant 0 : index
    %c0_2 = arith.constant 0 : index
    %1 = vector.load %arg2[%c0_1, %c0_2] : memref<256x80xf32, #tpu.memory_space<vmem>>, vector<256x80xf32>
    %cst = arith.constant dense<0.000000e+00> : vector<8x80xf32>
    %2 = tpu.matmul %0, %1, %cst {dimension_numbers = #tpu.dot_dimension_numbers<[1], [0], [0], [1], [0, 0, 1, 1], [], []>} : vector<8x256xf32>, vector<256x80xf32>, vector<8x80xf32> -> vector<8x80xf32>
    %c0_3 = arith.constant 0 : index
    %c0_4 = arith.constant 0 : index
    %3 = vector.load %arg3[%c0_3, %c0_4] : memref<1x80xf32, #tpu.memory_space<vmem>>, vector<1x80xf32>
    %4 = vector.broadcast %3 : vector<1x80xf32> to vector<8x80xf32>
    %5 = arith.addf %2, %4 : vector<8x80xf32>
    %c0_5 = arith.constant 0 : index
    %c0_6 = arith.constant 0 : index
    %6 = vector.load %arg4[%c0_5, %c0_6] : memref<8x80xf32, #tpu.memory_space<vmem>>, vector<8x80xf32>
    tpu.vector_store %arg4[%c0_5, %c0_6], %5 {strides = array<i32>} : memref<8x80xf32, #tpu.memory_space<vmem>>, vector<8x80xf32>,
    return
  }
  func.func @transform_0(%arg0: i32) -> (i32, i32) {
    %c0_i32 = arith.constant 0 : i32
    %c0_i32_0 = arith.constant 0 : i32
    return %arg0, %c0_i32 : i32, i32
  }
  func.func @transform_1(%arg0: i32) -> (i32, i32) {
    %c0_i32 = arith.constant 0 : i32
    %c0_i32_0 = arith.constant 0 : i32
    %c0_i32_1 = arith.constant 0 : i32
    return %c0_i32, %c0_i32_0 : i32, i32
  }
  func.func @transform_2(%arg0: i32) -> (i32, i32) {
    %c0_i32 = arith.constant 0 : i32
    %c0_i32_0 = arith.constant 0 : i32
    %c0_i32_1 = arith.constant 0 : i32
    return %c0_i32, %c0_i32_0 : i32, i32
  }
  func.func @transform_3(%arg0: i32) -> (i32, i32) {
    %c0_i32 = arith.constant 0 : i32
    %c0_i32_0 = arith.constant 0 : i32
    return %arg0, %c0_i32 : i32, i32
  }
}

</mosaic_0001>

<bundles_post_ra>
// kernel: tpu_custom_call.1
= control target key start
LH: loop header
LB: loop body
LE: loop exit
PB: predicated region body
PF: predicated region fallthrough
CT: control target
= control target key end

     0   :  { %s373_s0 = inlined_call_operand.vmem [shape: f32[8,256], index: 0, kind: input, shape index: {}]   ;;  %s374_s1 = inlined_call_operand.vmem [shape: f32[256,80], index: 1, kind: input, shape index: {}]   ;;  %s375_s2 = inlined_call_operand.vmem [shape: f32[1,80], index: 2, kind: input, shape index: {}]   ;;  %s376_s3 = inlined_call_operand.hbm [shape: f32[8,80], index: 3, kind: output, shape index: {}]  }
   0x1   :  { %v33_v0 = vld [vmem:[%s374_s1 + $0x80] sm:$0xff]  ;;  %v34_v1 = vld [vmem:[%s374_s1 + $0x88] sm:$0xff]  ;;  %v35_v5 = vld [vmem:[%s374_s1 + $0x90] sm:$0xff] }
   0x2   :  { %v17_v2 = vld [vmem:[%s374_s1] sm:$0xff]  ;;  %v178_v3 = vpack.c.bf16 %v34_v1, %v33_v0  ;;  %v18_v4 = vld [vmem:[%s374_s1 + $0x8] sm:$0xff]  ;;  %v36_v6 = vld [vmem:[%s374_s1 + $0x98] sm:$0xff] }
   0x3   :  { %v180_v7 = vpack.c.bf16 %v18_v4, %v17_v2  ;;  %v182_v8 = vpack.c.bf16 %v36_v6, %v35_v5  ;;  %v19_v9 = vld [vmem:[%s374_s1 + $0x10] sm:$0xff]  ;;  %v20_v10 = vld [vmem:[%s374_s1 + $0x18] sm:$0xff]  ;;  %v37_v11 = vld [vmem:[%s374_s1 + $0xa0] sm:$0xff] }
   0x4   :  { %179 = vmatprep.subr.bf16.mxu0 %v178_v3  ;;  %v38_v12 = vld [vmem:[%s374_s1 + $0xa8] sm:$0xff]  ;;  %v184_v13 = vpack.c.bf16 %v20_v10, %v19_v9  ;;  %v21_v15 = vld [vmem:[%s374_s1 + $0x20] sm:$0xff]  ;;  %v39_v17 = vld [vmem:[%s374_s1 + $0xb0] sm:$0xff] }
   0x5   :  { %181 = vmatpush3.bf16.msra.mxu0 %v180_v7  ;;  %v186_v14 = vpack.c.bf16 %v38_v12, %v37_v11  ;;  %v22_v16 = vld [vmem:[%s374_s1 + $0x28] sm:$0xff]  ;;  %v40_v18 = vld [vmem:[%s374_s1 + $0xb8] sm:$0xff]  ;;  %v23_v21 = vld [vmem:[%s374_s1 + $0x30] sm:$0xff] }
   0x6   :  { %183 = vmatprep.subr.bf16.mxu0 %v182_v8  ;;  %v188_v19 = vpack.c.bf16 %v22_v16, %v21_v15  ;;  %v190_v20 = vpack.c.bf16 %v40_v18, %v39_v17  ;;  %v24_v22 = vld [vmem:[%s374_s1 + $0x38] sm:$0xff]  ;;  %v41_v23 = vld [vmem:[%s374_s1 + $0xc0] sm:$0xff]  ;;  %v42_v24 = vld [vmem:[%s374_s1 + $0xc8] sm:$0xff] }
   0x7   :  { %v16_v25 = vld [vmem:[%s373_s0 + $0x8] sm:$0xff] }
   0x8   :  { %120 = vmatprep.mubr.f32.mxu0 %v16_v25 }
   0x9   :  { %185 = vmatpush3.bf16.msra.mxu0 %v184_v13 }
   0xa   :  { %187 = vmatprep.subr.bf16.mxu0 %v186_v14 }
   0xb   :  { %8 = vsyncpa [#allocation3], 0  ;;  %v192_v26 = vpack.c.bf16 %v24_v22, %v23_v21  ;;  %v194_v27 = vpack.c.bf16 %v42_v24, %v41_v23  ;;  %v25_v28 = vld [vmem:[%s374_s1 + $0x40] sm:$0xff]  ;;  %v26_v29 = vld [vmem:[%s374_s1 + $0x48] sm:$0xff]  ;;  %s235_s28 = smov [#allocation2]   ;;  %vm126_vm0 = vcmask 654336  }
   0xc   :  { %v43_v30 = vld [vmem:[%s374_s1 + $0xd0] sm:$0xff]  ;;  %v44_v31 = vld [vmem:[%s374_s1 + $0xd8] sm:$0xff]  ;;  %v196_v32 = vpack.c.bf16 %v26_v29, %v25_v28  ;;  %v45_v36 = vld [vmem:[%s374_s1 + $0xe0] sm:$0xff]  ;;  %s134_s29 = sshll.u32 %s235_s28, 4  ;;  %s135_s29 = int_to_ptr.vmem [resolvable:$true] %s134_s29 }
   0xd   :  { %189 = vmatpush3.bf16.msra.mxu0 %v188_v19  ;;  %v198_v33 = vpack.c.bf16 %v44_v31, %v43_v30  ;;  %v27_v34 = vld [vmem:[%s374_s1 + $0x50] sm:$0xff]  ;;  %v28_v35 = vld [vmem:[%s374_s1 + $0x58] sm:$0xff]  ;;  %v46_v37 = vld [vmem:[%s374_s1 + $0xe8] sm:$0xff]  ;;  %p216_p1 = scmp.lt.s32.totalorder %s135_s29, %s135_s29 }
   0xe   :  { %191 = vmatprep.subr.bf16.mxu0 %v190_v20  ;;  %v200_v38 = vpack.c.bf16 %v28_v35, %v27_v34  ;;  %v202_v39 = vpack.c.bf16 %v46_v37, %v45_v36  ;;  %v29_v40 = vld [vmem:[%s374_s1 + $0x60] sm:$0xff]  ;;  %v30_v41 = vld [vmem:[%s374_s1 + $0x68] sm:$0xff]  ;;  %v47_v42 = vld [vmem:[%s374_s1 + $0xf0] sm:$0xff] }
   0xf   :  { %v48_v43 = vld [vmem:[%s374_s1 + $0xf8] sm:$0xff]  ;;  %v204_v44 = vpack.c.bf16 %v30_v41, %v29_v40  ;;  %v31_v46 = vld [vmem:[%s374_s1 + $0x70] sm:$0xff]  ;;  %v15_v49 = vld [vmem:[%s373_s0] sm:$0xff] }
  0x10   :  { %v206_v45 = vpack.c.bf16 %v48_v43, %v47_v42  ;;  %v32_v47 = vld [vmem:[%s374_s1 + $0x78] sm:$0xff]  ;;  %v142_v51 = vld [vmem:[%s375_s2] ss:$0 sm:$0xff]  ;;  %s211_s1 = scalar_lea.vmem %s135_s29, 128 }
  0x11   :  { %193 = vmatpush3.bf16.msra.mxu0 %v192_v26  ;;  %v208_v48 = vpack.c.bf16 %v32_v47, %v31_v46  ;;  %p212_p0 = scmp.ne.s32.totalorder %s135_s29, %s211_s1  ;;  %p217_p2 = scmp.lt.s32.totalorder %s211_s1, %s211_s1 }
  0x12   :  { %195 = vmatprep.subr.bf16.mxu0 %v194_v27 }
  0x13   :  { %p218_p3 = por %p217_p2, %p216_p1 }
  0x15   :  { %197 = vmatpush3.bf16.msra.mxu0 %v196_v32  ;;  %p219_p4 = pnand %p218_p3, %p212_p0 }
  0x16   :  { %199 = vmatprep.subr.bf16.mxu0 %v198_v33 }
  0x19   :  { %201 = vmatpush3.bf16.msra.mxu0 %v200_v38 }
  0x1a   :  { %203 = vmatprep.subr.bf16.mxu0 %v202_v39 }
  0x1d   :  { %205 = vmatpush3.bf16.msra.mxu0 %v204_v44 }
  0x1e   :  { %207 = vmatprep.subr.bf16.mxu0 %v206_v45 }
  0x21   :  { %209 = vmatpush3.bf16.msra.mxu0 %v208_v48 }
  0x24   :  { %121 = vmatmul.mubr.f32.vlgmr.msra.gmra.mrb[0].mxu0 %v15_v49 }
  0xf7   :  { %v175_v50 = vpop.f32.mrb[0].mxu0 }
  0xf8   :  { %v176_v52 = vpop.f32.mrb[1].mxu0 }
  0xf9   :  { %v177_v53 = vadd.f32 %v176_v52, %v175_v50 }
  0xfb   :  { %v123_v54 = vadd.f32 %v177_v53, %v142_v51 }
  0xfd   :  { %127 = vst.msk [vmem:[#allocation2] sm:$0xff] %vm126_vm0, %v123_v54 }
  0xfe   :  { %222 = shalt.err (!%p219_p4)
}
  0xff   :  { %s223_s4 = scalar_lea.hbm %s376_s3, 128 }
 0x100   :  { %p224_p5 = scmp.ne.s32.totalorder %s376_s3, %s223_s4  ;;  %p227_p6 = scmp.lt.u32.totalorder %s223_s4, %s376_s3 }
 0x102   :  { %p229_p7 = pnand %p227_p6, %p224_p5 }
 0x104   :  { %232 = shalt.err (!%p229_p7)
}
 0x105   :  { %137 = dma.vmem_to_hbm [thread:$0]  %s135_s29, 128, %s376_s3, [#allocation3]  }
 0x106   :  { %233 = dma.done.wait [#allocation3], 128  }
 0x107   :  { %234 = vsyncadd [#allocation3], 4294967168 }
 0x108   :  { %141 = vsyncpa [#allocation3], 1 }

</bundles_post_ra>
